<compile_context>
chip_gen: v6e
topology: v6e:2x2x1
jax: 0.10.0
libtpu: 0.0.40
codegen_flags: <defaults>
</compile_context>

<pallas_src>
import math

import jax
import jax.numpy as jnp
from jax.experimental import pallas as pl
from jax.experimental.pallas import tpu as pltpu


def _round_up(x: int, m: int) -> int:
    return (x + m - 1) // m * m


def _stat_predictor_kernel(x_ref, w1_ref, b1_ref, w2m_ref, b2m_ref,
                           w2s_ref, b2s_ref, mu_ref, sigma_ref):
    # Hidden layer: (TB, E) @ (E, E) in bf16 on the MXU, f32 accumulation.
    h = jnp.dot(x_ref[...], w1_ref[...],
                preferred_element_type=jnp.float32) + b1_ref[...]
    h = h * jax.nn.sigmoid(h)                     # SiLU in f32 (EUP slot)
    h_bf = h.astype(jnp.bfloat16)

    # Output layer split into mu / sigma halves: each matmul writes directly to
    # its own lane-dense (128-padded) output ref -- no XLU relayout.
    mu = jnp.dot(h_bf, w2m_ref[...],
                 preferred_element_type=jnp.float32) + b2m_ref[...]
    sig_raw = jnp.dot(h_bf, w2s_ref[...],
                      preferred_element_type=jnp.float32) + b2s_ref[...]

    mu_ref[...] = mu.astype(mu_ref.dtype)
    # softplus(x) = log(1 + exp(x)), numerically stable via logaddexp; f32.
    sigma_ref[...] = (jnp.logaddexp(0.0, sig_raw) + 1e-6).astype(sigma_ref.dtype)


def stat_predictor(cond_emb, w1, b1, w2, b2, feature_dim, *, block_b=128):
    """cond_emb: (B, emb_dim) -> (mu (B, D), sigma (B, D)), both float32.

    Weights stored as (in_features, out_features): y = x @ W + b, equivalent to
    PyTorch's x @ W.T + b with W of shape (out, in).
    """
    B, emb_dim = cond_emb.shape
    D = feature_dim
    assert w1.shape == (emb_dim, emb_dim) and b1.shape == (emb_dim,)
    assert w2.shape == (emb_dim, 2 * D) and b2.shape == (2 * D,)

    # (1) Split w2/b2 into mu / sigma halves.
    w2_mu, w2_sig = w2[:, :D], w2[:, D:]
    b2_mu, b2_sig = b2[:D], b2[D:]

    # (3) Pad output feature dim to a lane-dense multiple of 128.
    D_pad = _round_up(D, 128)
    if D_pad != D:
        pc = ((0, 0), (0, D_pad - D))
        w2_mu, w2_sig = jnp.pad(w2_mu, pc), jnp.pad(w2_sig, pc)
        b2_mu = jnp.pad(b2_mu, ((0, D_pad - D),))
        b2_sig = jnp.pad(b2_sig, ((0, D_pad - D),))

    # (2) bf16 MXU operands; f32 biases (added post-accumulation).
    x_bf = cond_emb.astype(jnp.bfloat16)
    w1_bf = w1.astype(jnp.bfloat16)
    w2m_bf = w2_mu.astype(jnp.bfloat16)
    w2s_bf = w2_sig.astype(jnp.bfloat16)
    b1_2d = b1.reshape(1, emb_dim).astype(jnp.float32)
    b2m_2d = b2_mu.reshape(1, D_pad).astype(jnp.float32)
    b2s_2d = b2_sig.reshape(1, D_pad).astype(jnp.float32)

    # (4) Batch grid; TB multiple of 16 (bf16 sublane packing), batch padded.
    TB = min(block_b, _round_up(B, 16))
    B_pad = _round_up(B, TB)
    if B_pad != B:
        x_bf = jnp.pad(x_bf, ((0, B_pad - B), (0, 0)))
    grid = (B_pad // TB,)

    const = lambda i: (0, 0)   # weights / biases: resident, fetched once
    row = lambda i: (i, 0)     # x / outputs: tiled over batch
    in_specs = [
        pl.BlockSpec((TB, emb_dim), row),         # x
        pl.BlockSpec((emb_dim, emb_dim), const),  # w1
        pl.BlockSpec((1, emb_dim), const),        # b1
        pl.BlockSpec((emb_dim, D_pad), const),    # w2_mu
        pl.BlockSpec((1, D_pad), const),          # b2_mu
        pl.BlockSpec((emb_dim, D_pad), const),    # w2_sigma
        pl.BlockSpec((1, D_pad), const),          # b2_sigma
    ]
    out_specs = (
        pl.BlockSpec((TB, D_pad), row),           # mu
        pl.BlockSpec((TB, D_pad), row),           # sigma
    )

    # (7) VMEM budget: resident weights + double-buffered x/out tiles + headroom,
    # clamped to v7x's 64 MiB physical VMEM.
    w_bytes = (w1_bf.size + w2m_bf.size + w2s_bf.size) * 2 \
        + (b1_2d.size + b2m_2d.size + b2s_2d.size) * 4
    tile_bytes = TB * emb_dim * 2 + 2 * TB * D_pad * 4
    vmem_limit = int(min(max(2 * (w_bytes + tile_bytes) + (8 << 20), 32 << 20),
                         64 << 20))

    mu_p, sig_p = pl.pallas_call(
        _stat_predictor_kernel,
        out_shape=(
            jax.ShapeDtypeStruct((B_pad, D_pad), jnp.float32),
            jax.ShapeDtypeStruct((B_pad, D_pad), jnp.float32),
        ),
        grid=grid,
        in_specs=in_specs,
        out_specs=out_specs,
        compiler_params=pltpu.CompilerParams(
            dimension_semantics=("parallel",),   # (5) megacore-shard batch grid
            vmem_limit_bytes=vmem_limit,
        ),
    )(x_bf, w1_bf, b1_2d, w2m_bf, b2m_2d, w2s_bf, b2s_2d)

    # Padded rows / lanes are sliced away here (cheap wrapper-level view).
    return mu_p[:B, :D], sig_p[:B, :D]


def init_params(key, emb_dim, feature_dim):
    """Deterministic init mimicking PyTorch Linear default (U(+/- 1/sqrt(fan_in)))."""
    k1, k2, k3, k4 = jax.random.split(key, 4)
    bound = 1.0 / math.sqrt(emb_dim)
    w1 = jax.random.uniform(k1, (emb_dim, emb_dim), jnp.float32, -bound, bound)
    b1 = jax.random.uniform(k2, (emb_dim,), jnp.float32, -bound, bound)
    w2 = jax.random.uniform(k3, (emb_dim, 2 * feature_dim), jnp.float32, -bound, bound)
    b2 = jax.random.uniform(k4, (2 * feature_dim,), jnp.float32, -bound, bound)
    return w1, b1, w2, b2


if __name__ == "__main__":
    key = jax.random.PRNGKey(0)
    B, emb_dim, feature_dim = 8, 32, 16

    k_x, k_p = jax.random.split(key)
    cond_emb = jax.random.normal(k_x, (B, emb_dim), dtype=jnp.float32)
    w1, b1, w2, b2 = init_params(k_p, emb_dim, feature_dim)

    mu, sigma = stat_predictor(cond_emb, w1, b1, w2, b2, feature_dim)
    jax.block_until_ready((mu, sigma))

    # Reference 1: same bf16-operand / f32-accumulate contract as the kernel.
    xb = cond_emb.astype(jnp.bfloat16)
    h = jnp.dot(xb, w1.astype(jnp.bfloat16), preferred_element_type=jnp.float32) + b1
    h = h * jax.nn.sigmoid(h)
    y = jnp.dot(h.astype(jnp.bfloat16), w2.astype(jnp.bfloat16),
                preferred_element_type=jnp.float32) + b2
    mu_ref = y[:, :feature_dim]
    sig_ref = jax.nn.softplus(y[:, feature_dim:]) + 1e-6

    assert mu.shape == (B, feature_dim) and sigma.shape == (B, feature_dim)
    assert jnp.allclose(mu, mu_ref, atol=5e-3, rtol=5e-3)
    assert jnp.allclose(sigma, sig_ref, atol=5e-3, rtol=5e-3)

    # Reference 2: pure-f32 PyTorch-equivalent forward (bf16 MXU rounding only).
    h32 = cond_emb @ w1 + b1
    h32 = h32 * jax.nn.sigmoid(h32)
    y32 = h32 @ w2 + b2
    assert jnp.allclose(mu, y32[:, :feature_dim], atol=1e-1, rtol=1e-1)
    assert jnp.allclose(sigma, jax.nn.softplus(y32[:, feature_dim:]) + 1e-6,
                        atol=1e-1, rtol=1e-1)
    assert bool(jnp.all(sigma > 0))

    print("KERNEL_OK")
</pallas_src>

<mosaic_0001>
module attributes {stable_mosaic.version = 11 : i64} {
  func.func @_stat_predictor_kernel(%arg0: i32, %arg1: memref<16x32xbf16, #tpu.memory_space<vmem>>, %arg2: memref<32x32xbf16, #tpu.memory_space<vmem>>, %arg3: memref<1x32xf32, #tpu.memory_space<vmem>>, %arg4: memref<32x128xbf16, #tpu.memory_space<vmem>>, %arg5: memref<1x128xf32, #tpu.memory_space<vmem>>, %arg6: memref<32x128xbf16, #tpu.memory_space<vmem>>, %arg7: memref<1x128xf32, #tpu.memory_space<vmem>>, %arg8: memref<16x128xf32, #tpu.memory_space<vmem>>, %arg9: memref<16x128xf32, #tpu.memory_space<vmem>>) attributes {dimension_semantics = [#tpu.dimension_semantics<parallel>], iteration_bounds = array<i64: 1>, scalar_prefetch = 0 : i64, scratch_operands = 0 : i64, tpu.core_type = #tpu.core_type<tc>, window_params = [{transform_indices = @transform_0, window_bounds = array<i64: 16, 32>}, {pipeline_mode = #tpu.pipeline_mode<synchronous>, transform_indices = @transform_1, window_bounds = array<i64: 32, 32>}, {pipeline_mode = #tpu.pipeline_mode<synchronous>, transform_indices = @transform_2, window_bounds = array<i64: 1, 32>}, {pipeline_mode = #tpu.pipeline_mode<synchronous>, transform_indices = @transform_3, window_bounds = array<i64: 32, 128>}, {pipeline_mode = #tpu.pipeline_mode<synchronous>, transform_indices = @transform_4, window_bounds = array<i64: 1, 128>}, {pipeline_mode = #tpu.pipeline_mode<synchronous>, transform_indices = @transform_5, window_bounds = array<i64: 32, 128>}, {pipeline_mode = #tpu.pipeline_mode<synchronous>, transform_indices = @transform_6, window_bounds = array<i64: 1, 128>}, {transform_indices = @transform_7, window_bounds = array<i64: 16, 128>}, {transform_indices = @transform_8, window_bounds = array<i64: 16, 128>}]} {
    %c0 = arith.constant 0 : index
    %c0_0 = arith.constant 0 : index
    %0 = vector.load %arg1[%c0, %c0_0] : memref<16x32xbf16, #tpu.memory_space<vmem>>, vector<16x32xbf16>
    %c0_1 = arith.constant 0 : index
    %c0_2 = arith.constant 0 : index
    %1 = vector.load %arg2[%c0_1, %c0_2] : memref<32x32xbf16, #tpu.memory_space<vmem>>, vector<32x32xbf16>
    %cst = arith.constant dense<0.000000e+00> : vector<16x32xf32>
    %2 = tpu.matmul %0, %1, %cst {dimension_numbers = #tpu.dot_dimension_numbers<[1], [0], [0], [1], [0, 0, 1, 1], [], []>} : vector<16x32xbf16>, vector<32x32xbf16>, vector<16x32xf32> -> vector<16x32xf32>
    %c0_3 = arith.constant 0 : index
    %c0_4 = arith.constant 0 : index
    %3 = vector.load %arg3[%c0_3, %c0_4] : memref<1x32xf32, #tpu.memory_space<vmem>>, vector<1x32xf32>
    %4 = vector.broadcast %3 : vector<1x32xf32> to vector<16x32xf32>
    %5 = arith.addf %2, %4 : vector<16x32xf32>
    %6 = arith.negf %5 : vector<16x32xf32>
    %7 = math.exp %6 : vector<16x32xf32>
    %cst_5 = arith.constant 1.000000e+00 : f32
    %8 = vector.broadcast %cst_5 : f32 to vector<16x32xf32>
    %9 = arith.addf %8, %7 : vector<16x32xf32>
    %10 = arith.divf %8, %9 : vector<16x32xf32>
    %11 = arith.mulf %5, %10 : vector<16x32xf32>
    %12 = arith.truncf %11 : vector<16x32xf32> to vector<16x32xbf16>
    %c0_6 = arith.constant 0 : index
    %c0_7 = arith.constant 0 : index
    %13 = vector.load %arg4[%c0_6, %c0_7] : memref<32x128xbf16, #tpu.memory_space<vmem>>, vector<32x128xbf16>
    %cst_8 = arith.constant dense<0.000000e+00> : vector<16x128xf32>
    %14 = tpu.matmul %12, %13, %cst_8 {dimension_numbers = #tpu.dot_dimension_numbers<[1], [0], [0], [1], [0, 0, 1, 1], [], []>} : vector<16x32xbf16>, vector<32x128xbf16>, vector<16x128xf32> -> vector<16x128xf32>
    %c0_9 = arith.constant 0 : index
    %c0_10 = arith.constant 0 : index
    %15 = vector.load %arg5[%c0_9, %c0_10] : memref<1x128xf32, #tpu.memory_space<vmem>>, vector<1x128xf32>
    %16 = vector.broadcast %15 : vector<1x128xf32> to vector<16x128xf32>
    %17 = arith.addf %14, %16 : vector<16x128xf32>
    %c0_11 = arith.constant 0 : index
    %c0_12 = arith.constant 0 : index
    %18 = vector.load %arg6[%c0_11, %c0_12] : memref<32x128xbf16, #tpu.memory_space<vmem>>, vector<32x128xbf16>
    %cst_13 = arith.constant dense<0.000000e+00> : vector<16x128xf32>
    %19 = tpu.matmul %12, %18, %cst_13 {dimension_numbers = #tpu.dot_dimension_numbers<[1], [0], [0], [1], [0, 0, 1, 1], [], []>} : vector<16x32xbf16>, vector<32x128xbf16>, vector<16x128xf32> -> vector<16x128xf32>
    %c0_14 = arith.constant 0 : index
    %c0_15 = arith.constant 0 : index
    %20 = vector.load %arg7[%c0_14, %c0_15] : memref<1x128xf32, #tpu.memory_space<vmem>>, vector<1x128xf32>
    %21 = vector.broadcast %20 : vector<1x128xf32> to vector<16x128xf32>
    %22 = arith.addf %19, %21 : vector<16x128xf32>
    %c0_16 = arith.constant 0 : index
    %c0_17 = arith.constant 0 : index
    %23 = vector.load %arg8[%c0_16, %c0_17] : memref<16x128xf32, #tpu.memory_space<vmem>>, vector<16x128xf32>
    tpu.vector_store %arg8[%c0_16, %c0_17], %17 {strides = array<i32>} : memref<16x128xf32, #tpu.memory_space<vmem>>, vector<16x128xf32>,
    %cst_18 = arith.constant 0.000000e+00 : f32
    %24 = vector.broadcast %cst_18 : f32 to vector<16x128xf32>
    %25 = arith.maximumf %24, %22 : vector<16x128xf32>
    %26 = vector.broadcast %cst_18 : f32 to vector<16x128xf32>
    %27 = arith.subf %26, %22 : vector<16x128xf32>
    %28 = arith.cmpf one, %27, %27 : vector<16x128xf32>
    %29 = vector.broadcast %cst_18 : f32 to vector<16x128xf32>
    %30 = arith.addf %29, %22 : vector<16x128xf32>
    %31 = math.absf %27 : vector<16x128xf32>
    %cst_19 = arith.constant 0.000000e+00 : f32
    %32 = vector.broadcast %cst_19 : f32 to vector<16x128xf32>
    %33 = arith.subf %32, %31 : vector<16x128xf32>
    %34 = math.exp %33 : vector<16x128xf32>
    %35 = math.log1p %34 : vector<16x128xf32>
    %36 = arith.addf %25, %35 : vector<16x128xf32>
    %37 = arith.select %28, %30, %36 : vector<16x128xi1>, vector<16x128xf32>
    %cst_20 = arith.constant 9.99999997E-7 : f32
    %38 = vector.broadcast %cst_20 : f32 to vector<16x128xf32>
    %39 = arith.addf %37, %38 : vector<16x128xf32>
    %c0_21 = arith.constant 0 : index
    %c0_22 = arith.constant 0 : index
    %40 = vector.load %arg9[%c0_21, %c0_22] : memref<16x128xf32, #tpu.memory_space<vmem>>, vector<16x128xf32>
    tpu.vector_store %arg9[%c0_21, %c0_22], %39 {strides = array<i32>} : memref<16x128xf32, #tpu.memory_space<vmem>>, vector<16x128xf32>,
    return
  }
  func.func @transform_0(%arg0: i32) -> (i32, i32) {
    %c0_i32 = arith.constant 0 : i32
    %c0_i32_0 = arith.constant 0 : i32
    return %arg0, %c0_i32 : i32, i32
  }
  func.func @transform_1(%arg0: i32) -> (i32, i32) {
    %c0_i32 = arith.constant 0 : i32
    %c0_i32_0 = arith.constant 0 : i32
    %c0_i32_1 = arith.constant 0 : i32
    return %c0_i32, %c0_i32_0 : i32, i32
  }
  func.func @transform_2(%arg0: i32) -> (i32, i32) {
    %c0_i32 = arith.constant 0 : i32
    %c0_i32_0 = arith.constant 0 : i32
    %c0_i32_1 = arith.constant 0 : i32
    return %c0_i32, %c0_i32_0 : i32, i32
  }
  func.func @transform_3(%arg0: i32) -> (i32, i32) {
    %c0_i32 = arith.constant 0 : i32
    %c0_i32_0 = arith.constant 0 : i32
    %c0_i32_1 = arith.constant 0 : i32
    return %c0_i32, %c0_i32_0 : i32, i32
  }
  func.func @transform_4(%arg0: i32) -> (i32, i32) {
    %c0_i32 = arith.constant 0 : i32
    %c0_i32_0 = arith.constant 0 : i32
    %c0_i32_1 = arith.constant 0 : i32
    return %c0_i32, %c0_i32_0 : i32, i32
  }
  func.func @transform_5(%arg0: i32) -> (i32, i32) {
    %c0_i32 = arith.constant 0 : i32
    %c0_i32_0 = arith.constant 0 : i32
    %c0_i32_1 = arith.constant 0 : i32
    return %c0_i32, %c0_i32_0 : i32, i32
  }
  func.func @transform_6(%arg0: i32) -> (i32, i32) {
    %c0_i32 = arith.constant 0 : i32
    %c0_i32_0 = arith.constant 0 : i32
    %c0_i32_1 = arith.constant 0 : i32
    return %c0_i32, %c0_i32_0 : i32, i32
  }
  func.func @transform_7(%arg0: i32) -> (i32, i32) {
    %c0_i32 = arith.constant 0 : i32
    %c0_i32_0 = arith.constant 0 : i32
    return %arg0, %c0_i32 : i32, i32
  }
  func.func @transform_8(%arg0: i32) -> (i32, i32) {
    %c0_i32 = arith.constant 0 : i32
    %c0_i32_0 = arith.constant 0 : i32
    return %arg0, %c0_i32 : i32, i32
  }
}

</mosaic_0001>

<bundles_post_ra>
// kernel: tpu_custom_call.1
= control target key start
LH: loop header
LB: loop body
LE: loop exit
PB: predicated region body
PF: predicated region fallthrough
CT: control target
= control target key end

     0   :  { %14 = vsyncpa [#allocation3], 0  ;;  %s704_s0 = inlined_call_operand.hbm [shape: bf16[16,32], index: 0, kind: input, shape index: {}]   ;;  %s705_s1 = inlined_call_operand.hbm [shape: bf16[32,32], index: 1, kind: input, shape index: {}]   ;;  %s706_s2 = inlined_call_operand.vmem [shape: f32[1,32], index: 2, kind: input, shape index: {}]   ;;  %s707_s3 = inlined_call_operand.hbm [shape: bf16[32,128], index: 3, kind: input, shape index: {}]   ;;  %s708_s4 = inlined_call_operand.vmem [shape: f32[1,128], index: 4, kind: input, shape index: {}]   ;;  %s709_s5 = inlined_call_operand.hbm [shape: bf16[32,128], index: 5, kind: input, shape index: {}]   ;;  %s710_s6 = inlined_call_operand.vmem [shape: f32[1,128], index: 6, kind: input, shape index: {}]   ;;  %s711_s7 = inlined_call_operand.hbm [shape: f32[16,128], index: 7, kind: output, shape index: {0}]   ;;  %s712_s8 = inlined_call_operand.hbm [shape: f32[16,128], index: 8, kind: output, shape index: {1}]  }
   0x1   :  { %15 = vsyncpa [#allocation6], 0 }
   0x2   :  { %16 = vsyncpa [#allocation9], 0 }
   0x3   :  { %17 = vsyncpa [#allocation4], 0 }
   0x4   :  { %18 = vsyncpa [#allocation12], 0  ;;  %s599_s27 = smov [#allocation5]   ;;  %s600_s29 = smov [#allocation2]  }
   0x5   :  { %s36_s28 = sshll.u32 %s599_s27, 4  ;;  %s24_s30 = sshll.u32 %s600_s29, 4  ;;  %s37_s28 = int_to_ptr.vmem [resolvable:$true] %s36_s28  ;;  %s25_s30 = int_to_ptr.vmem [resolvable:$true] %s24_s30 }
   0x6   :  { %s477_s9 = scalar_lea.vmem %s37_s28, 256  ;;  %p482_p1 = scmp.lt.s32.totalorder %s37_s28, %s37_s28 }
   0x7   :  { %p478_p0 = scmp.ne.s32.totalorder %s37_s28, %s477_s9  ;;  %p483_p2 = scmp.lt.s32.totalorder %s477_s9, %s477_s9 }
   0x9   :  { %p484_p3 = por %p483_p2, %p482_p1 }
   0xb   :  { %p485_p4 = pnand %p484_p3, %p478_p0 }
   0xd   :  { %488 = shalt.err (!%p485_p4)
}
   0xe   :  { %s601_s10 = smov 64   ;;  %s602_s11 = smov 4  }
   0xf   :  { %42 = dma.hbm_to_vmem [thread:$0]  %s705_s1, 256, %s37_s28, [#allocation6], %s601_s10, %s601_s10, %s602_s11  }
  0x10   :  { %s497_s14 = scalar_lea.vmem %s25_s30, 128  ;;  %p502_p6 = scmp.lt.s32.totalorder %s25_s30, %s25_s30 }
  0x11   :  { %p498_p5 = scmp.ne.s32.totalorder %s25_s30, %s497_s14  ;;  %p503_p7 = scmp.lt.s32.totalorder %s497_s14, %s497_s14 }
  0x13   :  { %p504_p8 = por %p503_p7, %p502_p6 }
  0x15   :  { %p505_p9 = pnand %p504_p8, %p498_p5 }
  0x17   :  { %508 = shalt.err (!%p505_p9)
}
  0x18   :  { %30 = dma.hbm_to_vmem [thread:$0]  %s704_s0, 128, %s25_s30, [#allocation3], %s601_s10, %s601_s10, %s602_s11  }
  0x19   :  { %s603_s17 = smov [#allocation7]   ;;  %s604_s19 = smov [#allocation8]  }
  0x1a   :  { %s50_s18 = sshll.u32 %s603_s17, 4  ;;  %s64_s20 = sshll.u32 %s604_s19, 4  ;;  %s51_s18 = int_to_ptr.vmem [resolvable:$true] %s50_s18  ;;  %s65_s20 = int_to_ptr.vmem [resolvable:$true] %s64_s20 }
  0x1b   :  { %s517_s1 = scalar_lea.vmem %s51_s18, 256  ;;  %p522_p11 = scmp.lt.s32.totalorder %s51_s18, %s51_s18 }
  0x1c   :  { %p518_p10 = scmp.ne.s32.totalorder %s51_s18, %s517_s1  ;;  %p523_p12 = scmp.lt.s32.totalorder %s517_s1, %s517_s1 }
  0x1e   :  { %p524_p13 = por %p523_p12, %p522_p11 }
  0x20   :  { %p525_p0 = pnand %p524_p13, %p518_p10 }
  0x22   :  { %528 = shalt.err (!%p525_p0)
}
  0x23   :  { %56 = dma.hbm_to_vmem [thread:$0]  %s707_s3, 256, %s51_s18, [#allocation6], %s601_s10, %s601_s10, %s602_s11  }
  0x24   :  { %s537_s0 = scalar_lea.vmem %s65_s20, 256  ;;  %p542_p2 = scmp.lt.s32.totalorder %s65_s20, %s65_s20 }
  0x25   :  { %p538_p1 = scmp.ne.s32.totalorder %s65_s20, %s537_s0  ;;  %p543_p3 = scmp.lt.s32.totalorder %s537_s0, %s537_s0 }
  0x27   :  { %p544_p4 = por %p543_p3, %p542_p2 }
  0x29   :  { %p545_p5 = pnand %p544_p4, %p538_p1 }
  0x2b   :  { %548 = shalt.err (!%p545_p5)
}
  0x2c   :  { %70 = dma.hbm_to_vmem [thread:$0]  %s709_s5, 256, %s65_s20, [#allocation9], %s601_s10, %s601_s10, %s602_s11  }
  0x2d   :  { %589 = dma.done.wait [#allocation3], 128  }
  0x2e   :  { %590 = vsyncadd [#allocation3], 4294967168 }
  0x2f   :  { %591 = dma.done.wait [#allocation6], 512  }
  0x30   :  { %592 = vsyncadd [#allocation6], 4294966784 }
  0x31   :  { %593 = dma.done.wait [#allocation9], 256  }
  0x32   :  { %594 = vsyncadd [#allocation9], 4294967040  ;;  %v605_v0 = vmov 0.0   ;;  %vm606_vm0 = vmmov 0   ;;  %v446_v1 = vld [vmem:[#allocation5 + $0x8] sm:$0xff]   ;;  %v447_v2 = vld [vmem:[#allocation5] sm:$0xff]  }
  0x33   :  { %410 = vmatprep.subr.bf16.mxu0 %v605_v0  ;;  %414 = vmatprep.mubr.msk.bf16.mxu0 %vm606_vm0, %v605_v0  ;;  %v448_v3 = vld [vmem:[#allocation2] sm:$0xff]   ;;  %vm116_vm1 = vcmask 261120   ;;  %v449_v4 = vld [vmem:[#allocation8 + $0x8] sm:$0xff]   ;;  %v451_v6 = vld [vmem:[#allocation8] sm:$0xff]   ;;  %s607_s28 = smov [#allocation10]  }
  0x34   :  { %418 = vmatprep.subr.bf16.mxu1 %v605_v0  ;;  %422 = vmatprep.mubr.msk.bf16.mxu1 %vm606_vm0, %v605_v0  ;;  %v450_v5 = vld [vmem:[#allocation7 + $0x8] sm:$0xff]   ;;  %v452_v7 = vld [vmem:[#allocation7] sm:$0xff]   ;;  %s356_s29 = sshll.u32 %s607_s28, 4  ;;  %s357_s29 = int_to_ptr.vmem [resolvable:$true] %s356_s29 }
  0x35   :  { %411 = vmatpush3.bf16.msra.mxu0 %v446_v1  ;;  %419 = vmatpush3.bf16.msra.mxu1 %v450_v5  ;;  %v386_v8 = vld [vmem:[%s706_s2] ss:$0 sm:$0xff]  ;;  %p554_p7 = scmp.lt.s32.totalorder %s357_s29, %s357_s29 }
  0x36   :  { %412 = vmatprep.subr.bf16.mxu0 %v605_v0  ;;  %420 = vmatprep.subr.bf16.mxu1 %v605_v0  ;;  %v393_v26 = vld [vmem:[%s708_s4] ss:$0 sm:$0xff]  ;;  %s549_s4 = scalar_lea.vmem %s357_s29, 256 }
  0x37   :  { %v397_v27 = vld [vmem:[%s710_s6] ss:$0 sm:$0xff]  ;;  %p550_p6 = scmp.ne.s32.totalorder %s357_s29, %s549_s4  ;;  %p555_p8 = scmp.lt.s32.totalorder %s549_s4, %s549_s4 }
  0x39   :  { %413 = vmatpush3.bf16.msra.mxu0 %v447_v2  ;;  %421 = vmatpush3.bf16.msra.mxu1 %v452_v7  ;;  %p556_p9 = por %p555_p8, %p554_p7 }
  0x3a   :  { %426 = vmatprep.subr.bf16.mxu0 %v605_v0 }
  0x3b   :  { %p557_p10 = pnand %p556_p9, %p550_p6 }
  0x3c   :  { %415 = vmatmul.mubr.msk.bf16.vlgmr.msra.gmra.mxu0 %vm116_vm1, %v448_v3 }
  0x3d   :  { %430 = vmatprep.mubr.msk.bf16.mxu0 %vm606_vm0, %v605_v0  ;;  %427 = vmatpush3.bf16.msra.mxu0 %v449_v4 }
  0x3e   :  { %428 = vmatprep.subr.bf16.mxu0 %v605_v0 }
  0x41   :  { %429 = vmatpush3.bf16.msra.mxu0 %v451_v6 }
  0xfc   :  { %v154_v9 = vpop.f32.mrf.mxu0 }
  0xfd   :  { %v155_v10 = vadd.f32 %v386_v8, %v154_v9 }
  0xfe   :  { %v416_v11 = vpop.f32.mrf.mxu0 }
  0xff   :  { %v391_v12 = vmul.f32 -1.442695, %v155_v10 }
 0x100   :  { %v157_v13 = vpop.f32.mrf.mxu0 }
 0x101   :  { %453 = vpow2.f32 %v391_v12  ;;  %v158_v14 = vadd.f32 %v386_v8, %v157_v13 }
 0x102   :  { %v417_v15 = vpop.f32.mrf.mxu0 }
 0x103   :  { %v392_v16 = vmul.f32 -1.442695, %v158_v14 }
 0x105   :  { %455 = vpow2.f32 %v392_v16 }
 0x10e   :  { %v454_v17 = vpop.eup %453 }
 0x10f   :  { %v167_v18 = vadd.f32 1.0, %v454_v17 }
 0x111   :  { %457 = vrcp.f32 %v167_v18 }
 0x112   :  { %v456_v19 = vpop.eup %455 }
 0x113   :  { %v168_v20 = vadd.f32 1.0, %v456_v19 }
 0x115   :  { %459 = vrcp.f32 %v168_v20 }
 0x11e   :  { %v458_v21 = vpop.eup %457 }
 0x11f   :  { %v173_v23 = vmul.f32 %v458_v21, %v155_v10 }
 0x122   :  { %v460_v22 = vpop.eup %459 }
 0x123   :  { %v174_v24 = vmul.f32 %v460_v22, %v158_v14 }
 0x125   :  { %v175_v25 = vpack.c.bf16 %v174_v24, %v173_v23 }
 0x127   :  { %423 = vmatmul.mubr.msk.bf16.vlgmr.msra.gmra.mxu1 %vm116_vm1, %v175_v25  ;;  %431 = vmatmul.mubr.msk.bf16.vlgmr.msra.gmra.mxu0 %vm116_vm1, %v175_v25 }
 0x1e7   :  { %v236_v28 = vpop.f32.mrf.mxu1  ;;  %v300_v29 = vpop.f32.mrf.mxu0 }
 0x1e8   :  { %v237_v30 = vadd.f32 %v393_v26, %v236_v28  ;;  %v301_v31 = vadd.f32 %v397_v27, %v300_v29 }
 0x1e9   :  { %v424_v32 = vpop.f32.mrf.mxu1  ;;  %v432_v33 = vpop.f32.mrf.mxu0 }
 0x1ea   :  { %307 = vst [vmem:[#allocation10] sm:$0xff] %v237_v30  ;;  %v311_v34 = vsub.f32 0.0, %v301_v31 }
 0x1eb   :  { %v239_v35 = vpop.f32.mrf.mxu1  ;;  %v303_v36 = vpop.f32.mrf.mxu0 }
 0x1ec   :  { %v317_v37 = vand.u32 2147483647, %v311_v34  ;;  %v240_v38 = vadd.f32 %v393_v26, %v239_v35  ;;  %v304_v39 = vadd.f32 %v397_v27, %v303_v36 }
 0x1ed   :  { %v425_v40 = vpop.f32.mrf.mxu1  ;;  %v433_v41 = vpop.f32.mrf.mxu0 }
 0x1ee   :  { %v319_v42 = vsub.f32 0.0, %v317_v37  ;;  %308 = vst [vmem:[#allocation10 + $0x8] sm:$0xff] %v240_v38  ;;  %v312_v43 = vsub.f32 0.0, %v304_v39 }
 0x1ef   :  { %560 = shalt.err (!%p557_p10)
}
 0x1f0   :  { %s608_s6 = smov 128   ;;  %s609_s30 = smov 8   ;;  %v321_v44 = vmul.f32 1.442695, %v319_v42  ;;  %v318_v45 = vand.u32 2147483647, %v312_v43  ;;  %vm313_vm3 = vcmp.ne.f32.partialorder %v311_v34, %v311_v34  ;;  %vm314_vm5 = vcmp.ne.f32.partialorder %v312_v43, %v312_v43 }
 0x1f1   :  { %362 = dma.vmem_to_hbm [thread:$0]  %s357_s29, 256, %s711_s7, [#allocation4], %s608_s6, %s608_s6, %s609_s30   ;;  %v309_v60 = vmax.f32 %v301_v31, 0.0  ;;  %v310_v4 = vmax.f32 %v304_v39, 0.0 }
 0x1f2   :  { %461 = vpow2.f32 %v321_v44  ;;  %v320_v46 = vsub.f32 0.0, %v318_v45  ;;  %s610_s7 = smov [#allocation11]  }
 0x1f3   :  { %s368_s11 = sshll.u32 %s610_s7, 4  ;;  %s369_s11 = int_to_ptr.vmem [resolvable:$true] %s368_s11 }
 0x1f4   :  { %v323_v47 = vmul.f32 1.442695, %v320_v46  ;;  %s569_s12 = scalar_lea.vmem %s369_s11, 256  ;;  %p574_p12 = scmp.lt.s32.totalorder %s369_s11, %s369_s11 }
 0x1f5   :  { %p570_p11 = scmp.ne.s32.totalorder %s369_s11, %s569_s12  ;;  %p575_p13 = scmp.lt.s32.totalorder %s569_s12, %s569_s12 }
 0x1f6   :  { %463 = vpow2.f32 %v323_v47 }
 0x1f7   :  { %p576_p0 = por %p575_p13, %p574_p12 }
 0x1f9   :  { %p577_p1 = pnand %p576_p0, %p570_p11 }
 0x1ff   :  { %v462_v48 = vpop.eup %461 }
 0x200   :  { %v325_v49 = vadd.f32 1.0, %v462_v48  ;;  %v328_v52 = vmul.f32 -0.5, %v462_v48  ;;  %v331_v55 = vand.u32 2147483647, %v462_v48 }
 0x202   :  { %465 = vlog2.f32 %v325_v49  ;;  %v329_v53 = vadd.f32 1.0, %v328_v52  ;;  %vm332_vm2 = vcmp.lt.f32.partialorder %v331_v55, 0.0004427343 }
 0x203   :  { %v464_v50 = vpop.eup %463 }
 0x204   :  { %v334_v51 = vadd.f32 1.0, %v464_v50  ;;  %v337_v54 = vmul.f32 -0.5, %v464_v50  ;;  %v330_v58 = vmul.f32 %v462_v48, %v329_v53  ;;  %v340_v61 = vand.u32 2147483647, %v464_v50 }
 0x206   :  { %467 = vlog2.f32 %v334_v51  ;;  %v338_v59 = vadd.f32 1.0, %v337_v54  ;;  %vm341_vm4 = vcmp.lt.f32.partialorder %v340_v61, 0.0004427343 }
 0x208   :  { %v339_v2 = vmul.f32 %v464_v50, %v338_v59 }
 0x20f   :  { %v466_v56 = vpop.eup %465 }
 0x210   :  { %v327_v57 = vmul.f32 0.6931472, %v466_v56 }
 0x212   :  { %v333_v62 = vsel %vm332_vm2, %v330_v58, %v327_v57 }
 0x213   :  { %v468_v63 = vpop.eup %467  ;;  %v343_v0 = vadd.f32 %v333_v62, %v309_v60 }
 0x214   :  { %v336_v1 = vmul.f32 0.6931472, %v468_v63 }
 0x215   :  { %v345_v3 = vsel %vm313_vm3, %v301_v31, %v343_v0 }
 0x216   :  { %v347_v5 = vadd.f32 1e-06, %v345_v3  ;;  %v342_v6 = vsel %vm341_vm4, %v339_v2, %v336_v1 }
 0x217   :  { %v344_v7 = vadd.f32 %v342_v6, %v310_v4 }
 0x218   :  { %349 = vst [vmem:[#allocation11] sm:$0xff] %v347_v5 }
 0x219   :  { %v346_v8 = vsel %vm314_vm5, %v304_v39, %v344_v7 }
 0x21a   :  { %v348_v9 = vadd.f32 1e-06, %v346_v8 }
 0x21c   :  { %350 = vst [vmem:[#allocation11 + $0x8] sm:$0xff] %v348_v9 }
 0x21d   :  { %580 = shalt.err (!%p577_p1)
}
 0x21e   :  { %374 = dma.vmem_to_hbm [thread:$0]  %s369_s11, 256, %s712_s8, [#allocation12], %s608_s6, %s608_s6, %s609_s30  }
 0x21f   :  { %595 = dma.done.wait [#allocation4], 256  }
 0x220   :  { %596 = vsyncadd [#allocation4], 4294967040 }
 0x221   :  { %597 = dma.done.wait [#allocation12], 256  }
 0x222   :  { %598 = vsyncadd [#allocation12], 4294967040 }
 0x223   :  { %381 = vsyncpa [#allocation3], 1 }
 0x224   :  { %382 = vsyncpa [#allocation6], 1 }
 0x225   :  { %383 = vsyncpa [#allocation9], 1 }
 0x226   :  { %384 = vsyncpa [#allocation4], 1 }
 0x227   :  { %385 = vsyncpa [#allocation12], 1 }

</bundles_post_ra>
